<compile_context>
chip_gen: v7x
topology: tpu7x:2x2x1
jax: 0.10.0
libtpu: 0.0.40
codegen_flags: <defaults>
</compile_context>

<pallas_src>
import functools

import jax
import jax.numpy as jnp
from jax import lax
from jax.experimental import pallas as pl
from jax.experimental.pallas import tpu as pltpu


def _round_up(x, m):
    return (x + m - 1) // m * m


def _default_tile_rows(M, two_d, vmem_budget_bytes=8 * 1024 * 1024):
    """Pick a row-tile size (multiple of 8).

    Double-buffered per-row pipeline footprint ~= 2 * 4B * (1 index + 2D output).
    Budget of 8 MiB keeps the pipeline comfortably inside the scoped VMEM
    default on every generation (v5e 16 MiB scoped, v7x 64 MiB physical), so no
    vmem_limit_bytes override is needed.
    """
    per_row = 2 * 4 * (1 + two_d)
    cap = max(8, (vmem_budget_bytes // per_row) // 8 * 8)
    tm = min(512, cap)  # ~512-row tiles amortize the ~0.35us per-grid-step overhead
    # Keep at least 2 grid steps when the problem allows it so
    # dimension_semantics=("parallel",) can use both v7x TensorCores.
    half = _round_up(max(M // 2, 1), 8)
    tm = min(tm, max(8, half))
    return max(8, tm)


def film_kernel(x_ref, w_ref, emb_ref, *, num_categories):
    # x_ref:   (tm, 1)   int32   -- category index per row (VMEM block)
    # w_ref:   (C, 2D)   float   -- full embedding table, resident in VMEM (untiled)
    # emb_ref: (tm, 2D)  float   -- fused [gamma | beta] output block
    tm = x_ref.shape[0]
    # one_hot[m, c] = 1 iff x[m] == c   (F.one_hot(...).float())
    cats = lax.broadcasted_iota(jnp.int32, (tm, num_categories), 1)
    one_hot = (x_ref[...] == cats).astype(w_ref.dtype)  # exact 0/1 in table dtype
    # embedded = one_hot @ W  (== embedding lookup), runs on the MXU.
    emb_ref[...] = jnp.dot(
        one_hot, w_ref[...], preferred_element_type=jnp.float32
    ).astype(emb_ref.dtype)


def film_generator(x, weight, *, tm=None):
    """x: (B, S) int indices; weight: (num_categories, 2*output_size) float.

    Returns (gamma, beta), each (B, S, output_size), matching
    FiLMGenerator.forward.
    """
    num_categories, two_d = weight.shape
    assert two_d % 2 == 0, "embedding width must be 2 * output_size"
    output_size = two_d // 2
    B, S = x.shape
    M = B * S

    if tm is None:
        tm = _default_tile_rows(M, two_d)
    tm = max(8, _round_up(tm, 8))
    M_pad = _round_up(M, tm)
    grid = (M_pad // tm,)

    x_flat = x.reshape(M).astype(jnp.int32)
    if M_pad != M:
        # Pad with category 0; the padded rows are sliced off below.
        x_flat = jnp.pad(x_flat, (0, M_pad - M))
    x_flat = x_flat.reshape(M_pad, 1)

    kernel = functools.partial(film_kernel, num_categories=num_categories)

    emb_flat = pl.pallas_call(
        kernel,
        out_shape=jax.ShapeDtypeStruct((M_pad, two_d), weight.dtype),
        grid=grid,
        in_specs=[
            # Row tile of indices: (tm, 1), pipelined over the row grid.
            pl.BlockSpec((tm, 1), lambda i: (i, 0)),
            # Constant embedding table: one untiled VMEM-resident copy
            # (no per-step double-buffering of an unchanging block).
            pl.BlockSpec(memory_space=pltpu.MemorySpace.VMEM),
        ],
        # Single fused lane-dense output block (gamma | beta side by side).
        out_specs=pl.BlockSpec((tm, two_d), lambda i: (i, 0)),
        compiler_params=pltpu.CompilerParams(dimension_semantics=("parallel",)),
    )(x_flat, weight)

    emb = emb_flat[:M].reshape(B, S, two_d)
    gamma = emb[..., :output_size]   # torch.chunk(embedded, 2, dim=2)[0]
    beta = emb[..., output_size:]    # torch.chunk(embedded, 2, dim=2)[1]
    return gamma, beta


if __name__ == "__main__":
    # Module hyper-parameters (small, consistent with the module's __init__).
    num_categories = 8
    output_size = 32

    # Input: batch of category-index sequences, shape (B, S).
    B, S = 2, 8
    key = jax.random.PRNGKey(0)
    k_x, k_w = jax.random.split(key)
    x = jax.random.randint(k_x, (B, S), 0, num_categories, dtype=jnp.int32)

    # Deterministic "nn.Embedding" weight: (num_categories, 2*output_size).
    weight = jax.random.normal(k_w, (num_categories, 2 * output_size), dtype=jnp.float32)

    gamma, beta = film_generator(x, weight)
    gamma, beta = jax.block_until_ready((gamma, beta))

    # Reference check: embedding lookup == one_hot @ W.
    emb_ref = weight[x]                       # (B, S, 2*output_size)
    gamma_ref = emb_ref[..., :output_size]
    beta_ref = emb_ref[..., output_size:]
    assert gamma.shape == (B, S, output_size) and beta.shape == (B, S, output_size)
    assert jnp.allclose(gamma, gamma_ref, atol=1e-6)
    assert jnp.allclose(beta, beta_ref, atol=1e-6)

    print("KERNEL_OK")
</pallas_src>

<mosaic_0001>
module attributes {stable_mosaic.version = 11 : i64} {
  func.func @film_kernel(%arg0: i32, %arg1: memref<8x1xi32, #tpu.memory_space<vmem>>, %arg2: memref<8x64xf32, #tpu.memory_space<vmem>>, %arg3: memref<8x64xf32, #tpu.memory_space<vmem>>) attributes {dimension_semantics = [#tpu.dimension_semantics<parallel>], iteration_bounds = array<i64: 2>, scalar_prefetch = 0 : i64, scratch_operands = 0 : i64, tpu.core_type = #tpu.core_type<tc>, window_params = [{transform_indices = @transform_0, window_bounds = array<i64: 8, 1>}, {pipeline_mode = #tpu.pipeline_mode<synchronous>, transform_indices = @transform_1, window_bounds = array<i64: 8, 64>}, {transform_indices = @transform_2, window_bounds = array<i64: 8, 64>}]} {
    %0 = tpu.iota {dimensions = array<i32: 1>} : vector<8x8xi32>
    %c0 = arith.constant 0 : index
    %c0_0 = arith.constant 0 : index
    %1 = vector.load %arg1[%c0, %c0_0] : memref<8x1xi32, #tpu.memory_space<vmem>>, vector<8x1xi32>
    %2 = vector.broadcast %1 : vector<8x1xi32> to vector<8x8xi32>
    %3 = arith.cmpi eq, %2, %0 : vector<8x8xi32>
    %4 = arith.extui %3 : vector<8x8xi1> to vector<8x8xi32>
    %5 = arith.sitofp %4 : vector<8x8xi32> to vector<8x8xf32>
    %c0_1 = arith.constant 0 : index
    %c0_2 = arith.constant 0 : index
    %6 = vector.load %arg2[%c0_1, %c0_2] : memref<8x64xf32, #tpu.memory_space<vmem>>, vector<8x64xf32>
    %cst = arith.constant dense<0.000000e+00> : vector<8x64xf32>
    %7 = tpu.matmul %5, %6, %cst {dimension_numbers = #tpu.dot_dimension_numbers<[1], [0], [0], [1], [0, 0, 1, 1], [], []>} : vector<8x8xf32>, vector<8x64xf32>, vector<8x64xf32> -> vector<8x64xf32>
    %c0_3 = arith.constant 0 : index
    %c0_4 = arith.constant 0 : index
    %8 = vector.load %arg3[%c0_3, %c0_4] : memref<8x64xf32, #tpu.memory_space<vmem>>, vector<8x64xf32>
    tpu.vector_store %arg3[%c0_3, %c0_4], %7 {strides = array<i32>} : memref<8x64xf32, #tpu.memory_space<vmem>>, vector<8x64xf32>,
    return
  }
  func.func @transform_0(%arg0: i32) -> (i32, i32) {
    %c0_i32 = arith.constant 0 : i32
    %c0_i32_0 = arith.constant 0 : i32
    return %arg0, %c0_i32 : i32, i32
  }
  func.func @transform_1(%arg0: i32) -> (i32, i32) {
    %c0_i32 = arith.constant 0 : i32
    %c0_i32_0 = arith.constant 0 : i32
    %c0_i32_1 = arith.constant 0 : i32
    return %c0_i32, %c0_i32_0 : i32, i32
  }
  func.func @transform_2(%arg0: i32) -> (i32, i32) {
    %c0_i32 = arith.constant 0 : i32
    %c0_i32_0 = arith.constant 0 : i32
    return %arg0, %c0_i32 : i32, i32
  }
}

</mosaic_0001>

<bundles_post_ra>
// kernel: tpu_custom_call.1
= control target key start
LH: loop header
LB: loop body
LE: loop exit
PB: predicated region body
PF: predicated region fallthrough
CT: control target
= control target key end

     0   :  { %7 = vsyncpa [#allocation3], 0  ;;  %s546_s0 = inlined_call_operand.vmem [shape: s32[16,1], index: 0, kind: input, shape index: {}]   ;;  %s547_s1 = inlined_call_operand.vmem [shape: f32[8,64], index: 1, kind: input, shape index: {}]   ;;  %s548_s2 = inlined_call_operand.hbm [shape: f32[16,64], index: 2, kind: output, shape index: {}]  }
   0x1   :  { %9 = vsyncpa [#allocation3 + $0x1], 0  ;;  %s443_s9 = smov 0   ;;  %s445_s10 = smov 0  }
   0x2   :  { %s447_s11 = smov 0   ;;  %s449_s12 = smov 0  }
   0x3 LB: > { %s464_s13 = sadd.s32 4294967295, %s422_s12   ;;  %s298_s14 = sadd.s32 4294967294, %s422_s12   ;;  %s422_s12 = sphi %s449_s12, %s554_s12   ;;  %s418_s11 = sphi %s447_s11, %s553_s11   ;;  %s414_s10 = sphi %s445_s10, %s552_s10   ;;  %s410_s9 = sphi %s443_s9, %s551_s9  }
   0x4   : > { %s468_s15 = sadd.s32 1, %s422_s12   ;;  %s69_s16 = sadd.s32 1, %s418_s11 }
   0x5   : > { %s66_s17 = ssub.s32 %s422_s12, %s468_s15  ;;  %p79_p0 = scmp.ne.s32.totalorder %s418_s11, %s414_s10 }
   0x6   : > { %p67_p1 = scmp.eq.s32.totalorder %s66_s17, 0  ;;  %p80_p2 = scmp.eq.s32.totalorder %s464_s13, 1 }
   0x7   : > { %p85_p3 = scmp.ne.s32.totalorder %s414_s10, %s410_s9  ;;  %p86_p4 = scmp.eq.s32.totalorder %s298_s14, 1 }
   0x8   : > { %s479_s18 = scalar_select %p67_p1, %s418_s11, %s69_s16  }
   0x9   : > { %p481_p5 = por %p80_p2, %p79_p0  ;;  %p485_p6 = por %p86_p4, %p85_p3 }
   0xa   : > { %p301_p7 = scmp.ge.s32.totalorder %s422_s12, 1  ;;  %p114_p8 = scmp.lt.s32.totalorder %s422_s12, 3 }
   0xc   : > { %p115_p9 = pnand %p301_p7, %p114_p8 }
   0xd   : > { %p135_p10 = scmp.lt.s32.totalorder (!%p115_p9), %s464_s13, 1  ;;  %v424_v0 = vmov (!%p115_p9), 0   ;;  %v425_v1 = vmov (!%p115_p9), 0.0   ;;  %v148_v3 = vld [vmem:[%s547_s1] sm:$0xff] (!%p115_p9)  ;;  %vm426_vm0 = vmmov (!%p115_p9), 0   ;;  %v139_v4 = vlaneseq (!%p115_p9)  ;;  %s132_s28 = sand.u32 (!%p115_p9), 1, %s414_s10  }
   0xe   : > { %118 = sbr.rel (%p115_p9) target bundleno = 382 (0x17e), region = 28  ;;  %359 = vset.pattern.permute.xlu0 (!%p115_p9), %v424_v0  ;;  %312 = vmatprep.subr.mxu0 (!%p115_p9), %v425_v1  ;;  %vm149_vm1 = vcmask (!%p115_p9), 64512   ;;  %s302_s29 = sshll.u32 (!%p115_p9), %s132_s28, 3  ;;  %vm223_vm3 = vcmask (!%p115_p9), 523264  }
   0xf   : > { %313 = vmatpush3.msra.mxu0 (!%p115_p9), %v148_v3  ;;  %314 = vmatprep.mubr.msk.f32.mxu0 (!%p115_p9), %vm426_vm0, %v425_v1  ;;  %v140_v5 = vand.u32 (!%p115_p9), 127, %v139_v4  ;;  %s307_s30 = sshll.u32 (!%p115_p9), %s464_s13, 7  ;;  %s134_s3 = scalar_lea.vmem (!%p115_p9), [#allocation2], %s302_s29 }
  0x10   : > { %s239_s4 = sshll.u32 (!%p115_p9), %s134_s3, 4  ;;  %s504_s7 = scalar_lea.hbm (!%p115_p9), %s548_s2, %s307_s30  ;;  %s506_s4 = int_to_ptr.vmem [resolvable:$true] %s239_s4 }
  0x11   : > { %s226_s8 = scalar_lea.sflag (!%p115_p9), [#allocation3], %s132_s28  ;;  %s360_s14 = scalar_lea.vmem (!%p115_p9), %s506_s4, 128 }
  0x12   : > { %p361_p11 = scmp.ne.s32.totalorder (!%p115_p9), %s506_s4, %s360_s14 }
  0x14   : > { %p362_p12 = pnand (!%p115_p9), %p361_p11, %p481_p5 }
  0x15   : > { %s136_s21 = scalar_select %p135_p10, %s464_s13, 1 }
  0x16   : > { %p363_p13 = pneg %p362_p12  ;;  %s427_s13 = smov [#allocation2]  }
  0x17   : > { %s303_s22 = sshll.u32 %s136_s21, 3  ;;  %s364_s16 = sshll.u32 %s427_s13, 4  ;;  %s365_s16 = int_to_ptr.vmem [resolvable:$false] %s364_s16 }
  0x18   : > { %s138_s25 = scalar_lea.vmem %s546_s0, %s303_s22  ;;  %s366_s17 = scalar_lea.vmem %s365_s16, 256 }
  0x19   : > { %v141_v2 = vld [vmem:[%s138_s25] sm:$0xff]  ;;  %p367_p0 = scmp.lt.s32.totalorder %s506_s4, %s365_s16  ;;  %p368_p1 = scmp.lt.s32.totalorder %s366_s17, %s360_s14 }
  0x1a   : > { %143 = vperm.xlu0 %359, %v141_v2  }
  0x1b   : > { %p369_p2 = por %p368_p1, %p367_p0 }
  0x1d   : > { %p370_p3 = pnand %p369_p2, %p363_p13 }
  0x99   : > { %v144_v6 = vpop.permute.xlu0 %143 }
  0x9a   : > { %vm145_vm2 = vcmp.eq.s32.totalorder %v144_v6, %v140_v5 }
  0x9b   : > { %v304_v7 = vsel %vm145_vm2, 1.0, %v425_v1 }
  0x9c   : > { %315 = vmatmul.mubr.msk.f32.vlgmr.msra.gmra.mrb[0].mxu0 %vm149_vm1, %v304_v7 }
 0x16f   : > { %v219_v8 = vpop.f32.mrb[0].mxu0 }
 0x170   : > { %224 = vst.msk [vmem:[%s134_s3] sm:$0xff] %vm223_vm3, %v219_v8  ;;  %v316_v9 = vpop.f32.mrb[1].mxu0 }
 0x171   : > { %373 = shalt.err (!%p370_p3)
}
 0x172   : > { %s374_s21 = scalar_lea.hbm %s504_s7, 128  ;;  %s378_s24 = scalar_lea.hbm %s548_s2, 256 }
 0x173   : > { %p375_p4 = scmp.ne.s32.totalorder %s504_s7, %s374_s21  ;;  %p379_p9 = scmp.lt.u32.totalorder %s504_s7, %s548_s2 }
 0x174   : > { %p380_p10 = scmp.lt.u32.totalorder %s378_s24, %s374_s21  ;;  %p382_p12 = scmp.lt.u32.totalorder %s374_s21, %s504_s7 }
 0x175   : > { %p376_p7 = pnand %p375_p4, %p481_p5 }
 0x176   : > { %p381_p11 = por %p380_p10, %p379_p9 }
 0x177   : > { %p377_p8 = pneg %p376_p7 }
 0x178   : > { %p383_p13 = por %p382_p12, %p381_p11 }
 0x17a   : > { %p384_p0 = pnand %p383_p13, %p377_p8 }
 0x17c   : > { %387 = shalt.err (!%p384_p0)
}
 0x17d   : > { %317 = dma.vmem_to_hbm [thread:$0]  (%p481_p5), %s506_s4, 128, %s504_s7, %s226_s8  }
 0x17e PF: > { %p323_p1 = scmp.ge.s32.totalorder %s422_s12, 2  ;;  %s251_s27 = sand.u32 1, %s410_s9  }
 0x17f   : > { %s252_s28 = scalar_lea.sflag [#allocation3], %s251_s27 }
 0x180   : > { %p320_p2 = pnand %p323_p1, %p485_p6 }
 0x182   : > { %405 = dma.done.wait (!%p320_p2), %s252_s28, 128  }
 0x183   : > { %407 = vsyncadd (!%p320_p2), %s252_s28, 4294967168  ;;  %p12_p3 = scmp.ge.s32.totalorder %s468_s15, 4   ;;  %s551_s9 = smov %s414_s10 }
 0x184   : > { %s552_s10 = smov %s418_s11  ;;  %s553_s11 = smov %s479_s18 }
 0x185   : > { %s554_s12 = smov %s468_s15  ;;  %14 = sbr.rel (!%p12_p3) target bundleno = 3 (0x3), region = 63 }
 0x18c   :  { %257 = vsyncpa [#allocation3], 1 }
 0x18d   :  { %259 = vsyncpa [#allocation3 + $0x1], 1 }

</bundles_post_ra>
